<compile_context>
chip_gen: v7x
topology: tpu7x:2x2x1
jax: 0.10.0
libtpu: 0.0.40
codegen_flags: <defaults>
</compile_context>

<pallas_src>
import jax
import jax.numpy as jnp
from jax.experimental import pallas as pl
from jax.experimental.pallas import tpu as pltpu


def mlp_kernel(x_ref, w1_ref, b1_ref, w2_ref, b2_ref, w3_ref, b3_ref, o_ref):
    # All operands f32; MXU accumulation forced to f32 via preferred_element_type.
    x = x_ref[...]
    h1 = jnp.dot(x, w1_ref[...], preferred_element_type=jnp.float32) + b1_ref[...]
    h1 = jnp.maximum(h1, 0.0)
    h2 = jnp.dot(h1, w2_ref[...], preferred_element_type=jnp.float32) + b2_ref[...]
    h2 = jnp.maximum(h2, 0.0)
    logits = (jnp.dot(h2, w3_ref[...], preferred_element_type=jnp.float32)
              + b3_ref[...])
    o_ref[...] = jax.nn.sigmoid(logits).astype(o_ref.dtype)


def _round_up(n, m):
    return pl.cdiv(n, m) * m


def mlp_forward(x, w1, b1, w2, b2, w3, b3, *, tile_b=128):
    """y = sigmoid(relu(relu(x@w1+b1)@w2+b2)@w3+b3), fused Pallas TPU kernel.

    x:  (B, in)          f32
    wN: (in_N, out_N)    f32   (transposed vs torch.nn.Linear.weight)
    bN: (out_N,) or (1, out_N) f32
    """
    B, in_size = x.shape
    h1_size = w1.shape[1]
    h2_size = w2.shape[1]
    out_size = w3.shape[1]

    # f32 sublane rule: batch tile must be a multiple of 8.
    assert tile_b % 8 == 0, "tile_b must be a multiple of 8 (f32 sublane)"
    # Don't over-pad tiny batches.
    tile_b = min(tile_b, _round_up(B, 8))

    n_tiles = pl.cdiv(B, tile_b)
    b_p = n_tiles * tile_b

    # Pad batch rows (only) so every grid step gets a full tile.  Zero rows
    # are sliced off afterwards; feature dims are never padded.
    x_in = x if b_p == B else jnp.pad(x, ((0, b_p - B), (0, 0)))

    b1 = b1.reshape(1, h1_size)
    b2 = b2.reshape(1, h2_size)
    b3 = b3.reshape(1, out_size)

    # Grid-invariant full-array blocks for weights/biases (constant index_map
    # -> fetched once, resident in VMEM across all batch tiles).
    def full(shape):
        return pl.BlockSpec(shape, lambda i: (0, 0))

    out_padded = pl.pallas_call(
        mlp_kernel,
        out_shape=jax.ShapeDtypeStruct((b_p, out_size), jnp.float32),
        grid_spec=pltpu.PrefetchScalarGridSpec(
            num_scalar_prefetch=0,
            grid=(n_tiles,),
            in_specs=[
                pl.BlockSpec((tile_b, in_size), lambda i: (i, 0)),  # x tile
                full((in_size, h1_size)), full((1, h1_size)),       # fc1
                full((h1_size, h2_size)), full((1, h2_size)),       # fc2
                full((h2_size, out_size)), full((1, out_size)),     # fc3
            ],
            out_specs=pl.BlockSpec((tile_b, out_size), lambda i: (i, 0)),
        ),
        compiler_params=pltpu.CompilerParams(
            # Batch tiles are independent -> shard across the 2 TCs on v7x;
            # harmless (near-zero cost) on single-TC v5e/v6e.
            dimension_semantics=("parallel",),
        ),
    )(x_in, w1, b1, w2, b2, w3, b3)

    return out_padded if b_p == B else out_padded[:B]


def reference_forward(x, w1, b1, w2, b2, w3, b3):
    h = jnp.maximum(x @ w1 + b1.reshape(1, -1), 0.0)
    h = jnp.maximum(h @ w2 + b2.reshape(1, -1), 0.0)
    return jax.nn.sigmoid(h @ w3 + b3.reshape(1, -1))


if __name__ == "__main__":
    # Module-consistent widths: input_size=32, hidden1=64, hidden2=32, out=16.
    # Batch 256 with tile_b=128 -> exactly 2 grid steps (amortized pipeline
    # overhead on all chips; fills both TensorCores on v7x).
    B, IN, H1, H2, OUT = 256, 32, 64, 32, 16
    TILE_B = 128

    key = jax.random.PRNGKey(0)
    kx, k1, k2, k3, kb1, kb2, kb3 = jax.random.split(key, 7)

    x = jax.random.normal(kx, (B, IN), dtype=jnp.float32)

    # Deterministic parameter init (synthetic, PyTorch-Linear-like scaling).
    w1 = jax.random.uniform(k1, (IN, H1), minval=-1.0, maxval=1.0) / jnp.sqrt(IN)
    b1 = jax.random.uniform(kb1, (H1,), minval=-1.0, maxval=1.0) / jnp.sqrt(IN)
    w2 = jax.random.uniform(k2, (H1, H2), minval=-1.0, maxval=1.0) / jnp.sqrt(H1)
    b2 = jax.random.uniform(kb2, (H2,), minval=-1.0, maxval=1.0) / jnp.sqrt(H1)
    w3 = jax.random.uniform(k3, (H2, OUT), minval=-1.0, maxval=1.0) / jnp.sqrt(H2)
    b3 = jax.random.uniform(kb3, (OUT,), minval=-1.0, maxval=1.0) / jnp.sqrt(H2)

    w1, b1, w2, b2, w3, b3 = (a.astype(jnp.float32)
                              for a in (w1, b1, w2, b2, w3, b3))

    out = mlp_forward(x, w1, b1, w2, b2, w3, b3, tile_b=TILE_B)
    out = jax.block_until_ready(out)

    ref = reference_forward(x, w1, b1, w2, b2, w3, b3)
    assert out.shape == (B, OUT)
    # f32 operands end-to-end; tolerance only covers MXU default-precision
    # rounding differences between the fused kernel and the XLA reference.
    assert jnp.allclose(out, ref, atol=2e-2, rtol=2e-2), float(
        jnp.max(jnp.abs(out - ref)))

    print("KERNEL_OK")
</pallas_src>

<mosaic_0001>
module attributes {stable_mosaic.version = 11 : i64} {
  func.func @mlp_kernel(%arg0: i32, %arg1: memref<128x32xf32, #tpu.memory_space<vmem>>, %arg2: memref<32x64xf32, #tpu.memory_space<vmem>>, %arg3: memref<1x64xf32, #tpu.memory_space<vmem>>, %arg4: memref<64x32xf32, #tpu.memory_space<vmem>>, %arg5: memref<1x32xf32, #tpu.memory_space<vmem>>, %arg6: memref<32x16xf32, #tpu.memory_space<vmem>>, %arg7: memref<1x16xf32, #tpu.memory_space<vmem>>, %arg8: memref<128x16xf32, #tpu.memory_space<vmem>>) attributes {dimension_semantics = [#tpu.dimension_semantics<parallel>], iteration_bounds = array<i64: 2>, scalar_prefetch = 0 : i64, scratch_operands = 0 : i64, tpu.core_type = #tpu.core_type<tc>, window_params = [{transform_indices = @transform_0, window_bounds = array<i64: 128, 32>}, {pipeline_mode = #tpu.pipeline_mode<synchronous>, transform_indices = @transform_1, window_bounds = array<i64: 32, 64>}, {pipeline_mode = #tpu.pipeline_mode<synchronous>, transform_indices = @transform_2, window_bounds = array<i64: 1, 64>}, {pipeline_mode = #tpu.pipeline_mode<synchronous>, transform_indices = @transform_3, window_bounds = array<i64: 64, 32>}, {pipeline_mode = #tpu.pipeline_mode<synchronous>, transform_indices = @transform_4, window_bounds = array<i64: 1, 32>}, {pipeline_mode = #tpu.pipeline_mode<synchronous>, transform_indices = @transform_5, window_bounds = array<i64: 32, 16>}, {pipeline_mode = #tpu.pipeline_mode<synchronous>, transform_indices = @transform_6, window_bounds = array<i64: 1, 16>}, {transform_indices = @transform_7, window_bounds = array<i64: 128, 16>}]} {
    %c0 = arith.constant 0 : index
    %c0_0 = arith.constant 0 : index
    %0 = vector.load %arg1[%c0, %c0_0] : memref<128x32xf32, #tpu.memory_space<vmem>>, vector<128x32xf32>
    %c0_1 = arith.constant 0 : index
    %c0_2 = arith.constant 0 : index
    %1 = vector.load %arg2[%c0_1, %c0_2] : memref<32x64xf32, #tpu.memory_space<vmem>>, vector<32x64xf32>
    %cst = arith.constant dense<0.000000e+00> : vector<128x64xf32>
    %2 = tpu.matmul %0, %1, %cst {dimension_numbers = #tpu.dot_dimension_numbers<[1], [0], [0], [1], [0, 0, 1, 1], [], []>} : vector<128x32xf32>, vector<32x64xf32>, vector<128x64xf32> -> vector<128x64xf32>
    %c0_3 = arith.constant 0 : index
    %c0_4 = arith.constant 0 : index
    %3 = vector.load %arg3[%c0_3, %c0_4] : memref<1x64xf32, #tpu.memory_space<vmem>>, vector<1x64xf32>
    %4 = vector.broadcast %3 : vector<1x64xf32> to vector<128x64xf32>
    %5 = arith.addf %2, %4 : vector<128x64xf32>
    %cst_5 = arith.constant 0.000000e+00 : f32
    %6 = vector.broadcast %cst_5 : f32 to vector<128x64xf32>
    %7 = arith.maximumf %5, %6 : vector<128x64xf32>
    %c0_6 = arith.constant 0 : index
    %c0_7 = arith.constant 0 : index
    %8 = vector.load %arg4[%c0_6, %c0_7] : memref<64x32xf32, #tpu.memory_space<vmem>>, vector<64x32xf32>
    %cst_8 = arith.constant dense<0.000000e+00> : vector<128x32xf32>
    %9 = tpu.matmul %7, %8, %cst_8 {dimension_numbers = #tpu.dot_dimension_numbers<[1], [0], [0], [1], [0, 0, 1, 1], [], []>} : vector<128x64xf32>, vector<64x32xf32>, vector<128x32xf32> -> vector<128x32xf32>
    %c0_9 = arith.constant 0 : index
    %c0_10 = arith.constant 0 : index
    %10 = vector.load %arg5[%c0_9, %c0_10] : memref<1x32xf32, #tpu.memory_space<vmem>>, vector<1x32xf32>
    %11 = vector.broadcast %10 : vector<1x32xf32> to vector<128x32xf32>
    %12 = arith.addf %9, %11 : vector<128x32xf32>
    %cst_11 = arith.constant 0.000000e+00 : f32
    %13 = vector.broadcast %cst_11 : f32 to vector<128x32xf32>
    %14 = arith.maximumf %12, %13 : vector<128x32xf32>
    %c0_12 = arith.constant 0 : index
    %c0_13 = arith.constant 0 : index
    %15 = vector.load %arg6[%c0_12, %c0_13] : memref<32x16xf32, #tpu.memory_space<vmem>>, vector<32x16xf32>
    %cst_14 = arith.constant dense<0.000000e+00> : vector<128x16xf32>
    %16 = tpu.matmul %14, %15, %cst_14 {dimension_numbers = #tpu.dot_dimension_numbers<[1], [0], [0], [1], [0, 0, 1, 1], [], []>} : vector<128x32xf32>, vector<32x16xf32>, vector<128x16xf32> -> vector<128x16xf32>
    %c0_15 = arith.constant 0 : index
    %c0_16 = arith.constant 0 : index
    %17 = vector.load %arg7[%c0_15, %c0_16] : memref<1x16xf32, #tpu.memory_space<vmem>>, vector<1x16xf32>
    %18 = vector.broadcast %17 : vector<1x16xf32> to vector<128x16xf32>
    %19 = arith.addf %16, %18 : vector<128x16xf32>
    %20 = arith.negf %19 : vector<128x16xf32>
    %21 = math.exp %20 : vector<128x16xf32>
    %cst_17 = arith.constant 1.000000e+00 : f32
    %22 = vector.broadcast %cst_17 : f32 to vector<128x16xf32>
    %23 = arith.addf %22, %21 : vector<128x16xf32>
    %24 = arith.divf %22, %23 : vector<128x16xf32>
    %c0_18 = arith.constant 0 : index
    %c0_19 = arith.constant 0 : index
    %25 = vector.load %arg8[%c0_18, %c0_19] : memref<128x16xf32, #tpu.memory_space<vmem>>, vector<128x16xf32>
    tpu.vector_store %arg8[%c0_18, %c0_19], %24 {strides = array<i32>} : memref<128x16xf32, #tpu.memory_space<vmem>>, vector<128x16xf32>,
    return
  }
  func.func @transform_0(%arg0: i32) -> (i32, i32) {
    %c0_i32 = arith.constant 0 : i32
    %c0_i32_0 = arith.constant 0 : i32
    return %arg0, %c0_i32 : i32, i32
  }
  func.func @transform_1(%arg0: i32) -> (i32, i32) {
    %c0_i32 = arith.constant 0 : i32
    %c0_i32_0 = arith.constant 0 : i32
    %c0_i32_1 = arith.constant 0 : i32
    return %c0_i32, %c0_i32_0 : i32, i32
  }
  func.func @transform_2(%arg0: i32) -> (i32, i32) {
    %c0_i32 = arith.constant 0 : i32
    %c0_i32_0 = arith.constant 0 : i32
    %c0_i32_1 = arith.constant 0 : i32
    return %c0_i32, %c0_i32_0 : i32, i32
  }
  func.func @transform_3(%arg0: i32) -> (i32, i32) {
    %c0_i32 = arith.constant 0 : i32
    %c0_i32_0 = arith.constant 0 : i32
    %c0_i32_1 = arith.constant 0 : i32
    return %c0_i32, %c0_i32_0 : i32, i32
  }
  func.func @transform_4(%arg0: i32) -> (i32, i32) {
    %c0_i32 = arith.constant 0 : i32
    %c0_i32_0 = arith.constant 0 : i32
    %c0_i32_1 = arith.constant 0 : i32
    return %c0_i32, %c0_i32_0 : i32, i32
  }
  func.func @transform_5(%arg0: i32) -> (i32, i32) {
    %c0_i32 = arith.constant 0 : i32
    %c0_i32_0 = arith.constant 0 : i32
    %c0_i32_1 = arith.constant 0 : i32
    return %c0_i32, %c0_i32_0 : i32, i32
  }
  func.func @transform_6(%arg0: i32) -> (i32, i32) {
    %c0_i32 = arith.constant 0 : i32
    %c0_i32_0 = arith.constant 0 : i32
    %c0_i32_1 = arith.constant 0 : i32
    return %c0_i32, %c0_i32_0 : i32, i32
  }
  func.func @transform_7(%arg0: i32) -> (i32, i32) {
    %c0_i32 = arith.constant 0 : i32
    %c0_i32_0 = arith.constant 0 : i32
    return %arg0, %c0_i32 : i32, i32
  }
}

</mosaic_0001>

<bundles_post_ra>
// kernel: tpu_custom_call.1
= control target key start
LH: loop header
LB: loop body
LE: loop exit
PB: predicated region body
PF: predicated region fallthrough
CT: control target
= control target key end

     0   :  { %s1519_s24 = smov 0   ;;  %s1718_s0 = inlined_call_operand.vmem [shape: f32[256,32], index: 0, kind: input, shape index: {}]   ;;  %s1719_s1 = inlined_call_operand.vmem [shape: f32[32,64], index: 1, kind: input, shape index: {}]   ;;  %s1720_s2 = inlined_call_operand.vmem [shape: f32[1,64], index: 2, kind: input, shape index: {}]   ;;  %s1721_s3 = inlined_call_operand.vmem [shape: f32[64,32], index: 3, kind: input, shape index: {}]   ;;  %s1722_s4 = inlined_call_operand.vmem [shape: f32[1,32], index: 4, kind: input, shape index: {}]   ;;  %s1723_s5 = inlined_call_operand.vmem [shape: f32[32,16], index: 5, kind: input, shape index: {}]   ;;  %s1724_s6 = inlined_call_operand.vmem [shape: f32[1,16], index: 6, kind: input, shape index: {}]   ;;  %s1725_s7 = inlined_call_operand.vmem [shape: f32[256,16], index: 7, kind: output, shape index: {}]  }
   0x1 LB: > { %s1117_s25 = sadd.s32 4294967295, %s1477_s24   ;;  %p1121_p0 = scmp.ge.s32.totalorder %s1477_s24, 1  ;;  %s1477_s24 = sphi %s1519_s24, %s17_s24  }
   0x2   : > { %p238_p1 = scmp.lt.s32.totalorder %s1477_s24, 3 }
   0x4   : > { %p239_p2 = pnand %p1121_p0, %p238_p1 }
   0x5   : > { %v298_v0 = vld [vmem:[%s1719_s1] sm:$0xff] (!%p239_p2)  ;;  %v299_v1 = vld [vmem:[%s1719_s1 + $0x8] sm:$0xff] (!%p239_p2)  ;;  %v300_v2 = vld [vmem:[%s1719_s1 + $0x10] sm:$0xff] (!%p239_p2)  ;;  %s1122_s9 = sshll.u32 (!%p239_p2), %s1117_s25, 4  ;;  %vm309_vm0 = vcmask (!%p239_p2), 261120   ;;  %vm534_vm1 = vcmask (!%p239_p2), 523264  }
   0x6   : > { %242 = sbr.rel (%p239_p2) target bundleno = 726 (0x2d6), region = 48  ;;  %v1363_v3 = vpack.c.bf16 (!%p239_p2), %v299_v1, %v298_v0  ;;  %v301_v4 = vld [vmem:[%s1719_s1 + $0x18] sm:$0xff] (!%p239_p2)  ;;  %p271_p3 = scmp.lt.s32.totalorder (!%p239_p2), %s1122_s9, 31  ;;  %v519_v6 = vld [vmem:[%s1721_s3] sm:$0xff] (!%p239_p2)  ;;  %v520_v7 = vld [vmem:[%s1721_s3 + $0x8] sm:$0xff] (!%p239_p2)  ;;  %vm1044_vm2 = vcmask (!%p239_p2), 130048  }
   0x7   : > { %v1367_v5 = vpack.c.bf16 (!%p239_p2), %v301_v4, %v300_v2  ;;  %v1371_v8 = vpack.c.bf16 (!%p239_p2), %v520_v7, %v519_v6  ;;  %v521_v10 = vld [vmem:[%s1721_s3 + $0x10] sm:$0xff] (!%p239_p2)  ;;  %v522_v11 = vld [vmem:[%s1721_s3 + $0x18] sm:$0xff] (!%p239_p2)  ;;  %v523_v18 = vld [vmem:[%s1721_s3 + $0x20] sm:$0xff] (!%p239_p2) }
   0x8   : > { %1364 = vmatprep.subr.bf16.mxu0 (!%p239_p2), %v1363_v3  ;;  %1395 = vmatprep.subr.bf16.mxu1 (!%p239_p2), %v1363_v3  ;;  %v1375_v17 = vpack.c.bf16 (!%p239_p2), %v522_v11, %v521_v10  ;;  %v524_v19 = vld [vmem:[%s1721_s3 + $0x28] sm:$0xff] (!%p239_p2)  ;;  %v525_v31 = vld [vmem:[%s1721_s3 + $0x30] sm:$0xff] (!%p239_p2)  ;;  %v526_v32 = vld [vmem:[%s1721_s3 + $0x38] sm:$0xff] (!%p239_p2) }
   0x9   : > { %1366 = vmatpush3.bf16.msra.mxu0 (!%p239_p2), %v1363_v3  ;;  %1397 = vmatpush3.bf16.msra.mxu1 (!%p239_p2), %v1363_v3  ;;  %v1379_v24 = vpack.c.bf16 (!%p239_p2), %v524_v19, %v523_v18  ;;  %v1383_v33 = vpack.c.bf16 (!%p239_p2), %v526_v32, %v525_v31  ;;  %v744_v34 = vld [vmem:[%s1723_s5] sm:$0xff] (!%p239_p2)  ;;  %v745_v35 = vld [vmem:[%s1723_s5 + $0x8] sm:$0xff] (!%p239_p2)  ;;  %v746_v36 = vld [vmem:[%s1723_s5 + $0x10] sm:$0xff] (!%p239_p2) }
   0xa   : > { %1368 = vmatprep.subr.bf16.mxu0 (!%p239_p2), %v1367_v5  ;;  %1396 = vmatprep.subr.bf16.mxu1 (!%p239_p2), %v1367_v5  ;;  %v1387_v37 = vpack.c.bf16 (!%p239_p2), %v745_v35, %v744_v34  ;;  %v747_v38 = vld [vmem:[%s1723_s5 + $0x18] sm:$0xff] (!%p239_p2)  ;;  %v1126_v40 = vld [vmem:[%s1720_s2] ss:$0 sm:$0xff] (!%p239_p2) }
   0xb   : > { %v1391_v39 = vpack.c.bf16 (!%p239_p2), %v747_v38, %v746_v36 }
   0xd   : > { %s1727_s9 = smov (!%p271_p3, %s1122_s9), 31  ;;  %1370 = vmatpush3.bf16.msra.mxu0 %v1367_v5  ;;  %1398 = vmatpush3.bf16.msra.mxu1 %v1367_v5 }
   0xe   : > { %s1123_s16 = sshll.u32 %s1727_s9, 3  ;;  %1372 = vmatprep.subr.bf16.mxu1 %v1371_v8  ;;  %1388 = vmatprep.subr.bf16.mxu0 %v1387_v37 }
   0xf   : > { %s1553_s19 = scalar_lea.vmem %s1718_s0, %s1123_s16  ;;  %s1678_s29 = scalar_lea.vmem %s1725_s7, %s1123_s16 }
  0x10   : > { %v282_v9 = vld [vmem:[%s1553_s19] sm:$0xff]  ;;  %v283_v12 = vld [vmem:[%s1553_s19 + $0x8] sm:$0xff]  ;;  %v284_v13 = vld [vmem:[%s1553_s19 + $0x10] sm:$0xff] }
  0x11   : > { %1267 = vmatprep.mubr.msk.f32.mxu0 %vm309_vm0, %v282_v9  ;;  %v290_v14 = vld [vmem:[%s1553_s19 + $0x40] sm:$0xff]  ;;  %v291_v15 = vld [vmem:[%s1553_s19 + $0x48] sm:$0xff]  ;;  %v292_v16 = vld [vmem:[%s1553_s19 + $0x50] sm:$0xff] }
  0x12   : > { %1279 = vmatprep.mubr.msk.f32.mxu1 %vm309_vm0, %v290_v14  ;;  %1268 = vmatmul.mubr.msk.f32.vlgmr.msra.gmra.mrb[0].mxu0 %vm309_vm0, %v283_v12  ;;  %v285_v20 = vld [vmem:[%s1553_s19 + $0x18] sm:$0xff]  ;;  %v286_v21 = vld [vmem:[%s1553_s19 + $0x20] sm:$0xff]  ;;  %v287_v25 = vld [vmem:[%s1553_s19 + $0x28] sm:$0xff] }
  0x13   : > { %1270 = vmatprep.mubr.msk.f32.mxu0 %vm309_vm0, %v284_v13  ;;  %1280 = vmatmul.mubr.msk.f32.vlgmr.msra.gmra.mrb[0].mxu1 %vm309_vm0, %v291_v15  ;;  %v293_v22 = vld [vmem:[%s1553_s19 + $0x58] sm:$0xff]  ;;  %v294_v23 = vld [vmem:[%s1553_s19 + $0x60] sm:$0xff]  ;;  %v288_v26 = vld [vmem:[%s1553_s19 + $0x30] sm:$0xff] }
  0x14   : > { %1282 = vmatprep.mubr.msk.f32.mxu1 %vm309_vm0, %v292_v16  ;;  %1374 = vmatpush3.bf16.msra.mxu1 %v1371_v8  ;;  %v295_v27 = vld [vmem:[%s1553_s19 + $0x68] sm:$0xff]  ;;  %v296_v28 = vld [vmem:[%s1553_s19 + $0x70] sm:$0xff]  ;;  %v289_v29 = vld [vmem:[%s1553_s19 + $0x38] sm:$0xff] }
  0x15   : > { %1376 = vmatprep.subr.bf16.mxu1 %v1375_v17  ;;  %v297_v30 = vld [vmem:[%s1553_s19 + $0x78] sm:$0xff]  ;;  %1390 = vmatpush3.bf16.msra.mxu0 %v1387_v37 }
  0x16   : > { %1271 = vmatmul.mubr.msk.f32.gmra.mrb[2].mxu0 %vm309_vm0, %v285_v20  ;;  %1392 = vmatprep.subr.bf16.mxu0 %v1391_v39 }
  0x17   : > { %1273 = vmatprep.mubr.msk.f32.mxu0 %vm309_vm0, %v286_v21  ;;  %1283 = vmatmul.mubr.msk.f32.gmra.mrb[2].mxu1 %vm309_vm0, %v293_v22 }
  0x18   : > { %1285 = vmatprep.mubr.msk.f32.mxu1 %vm309_vm0, %v294_v23  ;;  %1378 = vmatpush3.bf16.msra.mxu1 %v1375_v17 }
  0x19   : > { %1380 = vmatprep.subr.bf16.mxu1 %v1379_v24  ;;  %1394 = vmatpush3.bf16.msra.mxu0 %v1391_v39 }
  0x1a   : > { %1274 = vmatmul.mubr.msk.f32.gmra.mrb[4].mxu0 %vm309_vm0, %v287_v25  ;;  %v1143_v25 = vld [vmem:[%s1722_s4] ss:$0 sm:$0xff] }
  0x1b   : > { %1276 = vmatprep.mubr.msk.f32.mxu0 %vm309_vm0, %v288_v26  ;;  %1286 = vmatmul.mubr.msk.f32.gmra.mrb[4].mxu1 %vm309_vm0, %v295_v27 }
  0x1c   : > { %1288 = vmatprep.mubr.msk.f32.mxu1 %vm309_vm0, %v296_v28  ;;  %1382 = vmatpush3.bf16.msra.mxu1 %v1379_v24 }
  0x1d   : > { %1384 = vmatprep.subr.bf16.mxu1 %v1383_v33 }
  0x1e   : > { %1277 = vmatmul.mubr.msk.f32.gmra.mrb[6].mxu0 %vm309_vm0, %v289_v29 }
  0x1f   : > { %1289 = vmatmul.mubr.msk.f32.gmra.mrb[6].mxu1 %vm309_vm0, %v297_v30 }
  0x20   : > { %1386 = vmatpush3.bf16.msra.mxu1 %v1383_v33 }
  0xe5   : > { %v1269_v41 = vpop.f32.mrb[0].mxu0 }
  0xe6   : > { %v430_v42 = vadd.f32 %v1269_v41, %v1126_v40  ;;  %v424_v43 = vpop.f32.mrb[1].mxu0  ;;  %v1281_v44 = vpop.f32.mrb[0].mxu1 }
  0xe7   : > { %v425_v45 = vadd.f32 %v1126_v40, %v424_v43  ;;  %v464_v46 = vpop.f32.mrb[1].mxu1  ;;  %v470_v12 = vadd.f32 %v1281_v44, %v1126_v40 }
  0xe8   : > { %v504_v49 = vmax.f32 %v430_v42, 0.0  ;;  %v465_v1 = vadd.f32 %v1126_v40, %v464_v46 }
  0xe9   : > { %v503_v47 = vmax.f32 %v425_v45, 0.0  ;;  %v1272_v48 = vpop.f32.mrb[2].mxu0  ;;  %v512_v15 = vmax.f32 %v470_v12, 0.0 }
  0xea   : > { %v440_v50 = vadd.f32 %v1272_v48, %v1126_v40  ;;  %v434_v51 = vpop.f32.mrb[3].mxu0  ;;  %v1284_v52 = vpop.f32.mrb[2].mxu1  ;;  %v511_v9 = vmax.f32 %v465_v1, 0.0 }
  0xeb   : > { %v435_v53 = vadd.f32 %v1126_v40, %v434_v51  ;;  %1307 = vmatprep.mubr.msk.f32.mxu1 %vm534_vm1, %v503_v47  ;;  %v474_v54 = vpop.f32.mrb[3].mxu1  ;;  %v480_v16 = vadd.f32 %v1284_v52, %v1126_v40 }
  0xec   : > { %1308 = vmatmul.mubr.msk.f32.vlgmr.msra.gmra.mrb[8].mxu1 %vm534_vm1, %v504_v49  ;;  %v506_v57 = vmax.f32 %v440_v50, 0.0  ;;  %v475_v10 = vadd.f32 %v1126_v40, %v474_v54 }
  0xed   : > { %v505_v55 = vmax.f32 %v435_v53, 0.0  ;;  %v1275_v56 = vpop.f32.mrb[4].mxu0  ;;  %v514_v19 = vmax.f32 %v480_v16, 0.0 }
  0xee   : > { %v450_v58 = vadd.f32 %v1275_v56, %v1126_v40  ;;  %v444_v59 = vpop.f32.mrb[5].mxu0  ;;  %v1287_v60 = vpop.f32.mrb[4].mxu1  ;;  %v513_v13 = vmax.f32 %v475_v10, 0.0  ;;  %v1658_v10 = vld [vmem:[%s1724_s6] ss:$0 sm:$0xff] }
  0xef   : > { %v445_v61 = vadd.f32 %v1126_v40, %v444_v59  ;;  %1310 = vmatprep.mubr.msk.f32.mxu1 %vm534_vm1, %v505_v55  ;;  %v484_v62 = vpop.f32.mrb[5].mxu1  ;;  %v490_v20 = vadd.f32 %v1287_v60, %v1126_v40 }
  0xf0   : > { %1311 = vmatmul.mubr.msk.f32.gmra.mrb[10].mxu1 %vm534_vm1, %v506_v57  ;;  %v508_v2 = vmax.f32 %v450_v58, 0.0  ;;  %v485_v14 = vadd.f32 %v1126_v40, %v484_v62 }
  0xf1   : > { %v507_v63 = vmax.f32 %v445_v61, 0.0  ;;  %v1278_v0 = vpop.f32.mrb[6].mxu0  ;;  %v516_v22 = vmax.f32 %v490_v20, 0.0 }
  0xf2   : > { %v460_v3 = vadd.f32 %v1278_v0, %v1126_v40  ;;  %v454_v4 = vpop.f32.mrb[7].mxu0  ;;  %v1290_v5 = vpop.f32.mrb[6].mxu1  ;;  %v515_v17 = vmax.f32 %v485_v14, 0.0 }
  0xf3   : > { %v455_v6 = vadd.f32 %v1126_v40, %v454_v4  ;;  %1313 = vmatprep.mubr.msk.f32.mxu1 %vm534_vm1, %v507_v63  ;;  %v494_v7 = vpop.f32.mrb[7].mxu1  ;;  %v500_v23 = vadd.f32 %v1290_v5, %v1126_v40 }
  0xf4   : > { %1314 = vmatmul.mubr.msk.f32.gmra.mrb[12].mxu1 %vm534_vm1, %v508_v2  ;;  %v510_v11 = vmax.f32 %v460_v3, 0.0  ;;  %v495_v18 = vadd.f32 %v1126_v40, %v494_v7 }
  0xf5   : > { %v509_v8 = vmax.f32 %v455_v6, 0.0  ;;  %v518_v24 = vmax.f32 %v500_v23, 0.0 }
  0xf6   : > { %v517_v21 = vmax.f32 %v495_v18, 0.0 }
  0xf7   : > { %1316 = vmatprep.mubr.msk.f32.mxu1 %vm534_vm1, %v509_v8 }
  0xf8   : > { %1317 = vmatmul.mubr.msk.f32.gmra.mrb[14].mxu1 %vm534_vm1, %v510_v11 }
  0xf9   : > { %1319 = vmatprep.mubr.msk.f32.mxu1 %vm534_vm1, %v511_v9 }
  0xfc   : > { %1320 = vmatmul.mubr.msk.f32.gmra.mrb[16].mxu1 %vm534_vm1, %v512_v15 }
  0xfd   : > { %1322 = vmatprep.mubr.msk.f32.mxu1 %vm534_vm1, %v513_v13 }
 0x100   : > { %1323 = vmatmul.mubr.msk.f32.gmra.mrb[18].mxu1 %vm534_vm1, %v514_v19 }
 0x101   : > { %1325 = vmatprep.mubr.msk.f32.mxu1 %vm534_vm1, %v515_v17 }
 0x104   : > { %1326 = vmatmul.mubr.msk.f32.gmra.mrb[20].mxu1 %vm534_vm1, %v516_v22 }
 0x105   : > { %1328 = vmatprep.mubr.msk.f32.mxu1 %vm534_vm1, %v517_v21 }
 0x108   : > { %1329 = vmatmul.mubr.msk.f32.gmra.mrb[22].mxu1 %vm534_vm1, %v518_v24 }
 0x1bf   : > { %v1309_v26 = vpop.f32.mrb[8].mxu1 }
 0x1c0   : > { %v655_v27 = vadd.f32 %v1309_v26, %v1143_v25  ;;  %v649_v28 = vpop.f32.mrb[9].mxu1 }
 0x1c1   : > { %v650_v29 = vadd.f32 %v1143_v25, %v649_v28 }
 0x1c2   : > { %v729_v32 = vmax.f32 %v655_v27, 0.0 }
 0x1c3   : > { %v728_v30 = vmax.f32 %v650_v29, 0.0  ;;  %v1312_v31 = vpop.f32.mrb[10].mxu1 }
 0x1c4   : > { %v665_v33 = vadd.f32 %v1312_v31, %v1143_v25  ;;  %v659_v34 = vpop.f32.mrb[11].mxu1 }
 0x1c5   : > { %v660_v35 = vadd.f32 %v1143_v25, %v659_v34  ;;  %1339 = vmatprep.mubr.msk.f32.mxu0 %vm309_vm0, %v728_v30 }
 0x1c6   : > { %1340 = vmatmul.mubr.msk.f32.vlgmr.msra.gmra.mrb[8].mxu0 %vm309_vm0, %v729_v32  ;;  %v731_v38 = vmax.f32 %v665_v33, 0.0 }
 0x1c7   : > { %v730_v36 = vmax.f32 %v660_v35, 0.0  ;;  %v1315_v37 = vpop.f32.mrb[12].mxu1 }
 0x1c8   : > { %v675_v39 = vadd.f32 %v1315_v37, %v1143_v25  ;;  %v669_v40 = vpop.f32.mrb[13].mxu1 }
 0x1c9   : > { %v670_v41 = vadd.f32 %v1143_v25, %v669_v40  ;;  %1342 = vmatprep.mubr.msk.f32.mxu0 %vm309_vm0, %v730_v36 }
 0x1ca   : > { %1343 = vmatmul.mubr.msk.f32.gmra.mrb[10].mxu0 %vm309_vm0, %v731_v38  ;;  %v733_v44 = vmax.f32 %v675_v39, 0.0 }
 0x1cb   : > { %v732_v42 = vmax.f32 %v670_v41, 0.0  ;;  %v1318_v43 = vpop.f32.mrb[14].mxu1 }
 0x1cc   : > { %v685_v45 = vadd.f32 %v1318_v43, %v1143_v25  ;;  %v679_v46 = vpop.f32.mrb[15].mxu1 }
 0x1cd   : > { %v680_v47 = vadd.f32 %v1143_v25, %v679_v46  ;;  %1345 = vmatprep.mubr.msk.f32.mxu0 %vm309_vm0, %v732_v42 }
 0x1ce   : > { %1346 = vmatmul.mubr.msk.f32.gmra.mrb[12].mxu0 %vm309_vm0, %v733_v44  ;;  %v735_v50 = vmax.f32 %v685_v45, 0.0 }
 0x1cf   : > { %v734_v48 = vmax.f32 %v680_v47, 0.0  ;;  %v1321_v49 = vpop.f32.mrb[16].mxu1 }
 0x1d0   : > { %v695_v51 = vadd.f32 %v1321_v49, %v1143_v25  ;;  %v689_v52 = vpop.f32.mrb[17].mxu1 }
 0x1d1   : > { %v690_v53 = vadd.f32 %v1143_v25, %v689_v52  ;;  %1348 = vmatprep.mubr.msk.f32.mxu0 %vm309_vm0, %v734_v48 }
 0x1d2   : > { %1349 = vmatmul.mubr.msk.f32.gmra.mrb[14].mxu0 %vm309_vm0, %v735_v50  ;;  %v737_v56 = vmax.f32 %v695_v51, 0.0 }
 0x1d3   : > { %v736_v54 = vmax.f32 %v690_v53, 0.0  ;;  %v1324_v55 = vpop.f32.mrb[18].mxu1 }
 0x1d4   : > { %v705_v57 = vadd.f32 %v1324_v55, %v1143_v25  ;;  %v699_v58 = vpop.f32.mrb[19].mxu1 }
 0x1d5   : > { %v700_v59 = vadd.f32 %v1143_v25, %v699_v58  ;;  %1351 = vmatprep.mubr.msk.f32.mxu0 %vm309_vm0, %v736_v54 }
 0x1d6   : > { %1352 = vmatmul.mubr.msk.f32.gmra.mrb[16].mxu0 %vm309_vm0, %v737_v56  ;;  %v739_v62 = vmax.f32 %v705_v57, 0.0 }
 0x1d7   : > { %v738_v60 = vmax.f32 %v700_v59, 0.0  ;;  %v1327_v61 = vpop.f32.mrb[20].mxu1 }
 0x1d8   : > { %v715_v63 = vadd.f32 %v1327_v61, %v1143_v25  ;;  %v709_v0 = vpop.f32.mrb[21].mxu1 }
 0x1d9   : > { %v710_v1 = vadd.f32 %v1143_v25, %v709_v0  ;;  %1354 = vmatprep.mubr.msk.f32.mxu0 %vm309_vm0, %v738_v60 }
 0x1da   : > { %1355 = vmatmul.mubr.msk.f32.gmra.mrb[18].mxu0 %vm309_vm0, %v739_v62  ;;  %v741_v4 = vmax.f32 %v715_v63, 0.0 }
 0x1db   : > { %v740_v2 = vmax.f32 %v710_v1, 0.0  ;;  %v1330_v3 = vpop.f32.mrb[22].mxu1 }
 0x1dc   : > { %v725_v5 = vadd.f32 %v1330_v3, %v1143_v25  ;;  %v719_v6 = vpop.f32.mrb[23].mxu1 }
 0x1dd   : > { %v720_v7 = vadd.f32 %v1143_v25, %v719_v6  ;;  %1357 = vmatprep.mubr.msk.f32.mxu0 %vm309_vm0, %v740_v2 }
 0x1de   : > { %1358 = vmatmul.mubr.msk.f32.gmra.mrb[20].mxu0 %vm309_vm0, %v741_v4  ;;  %v743_v9 = vmax.f32 %v725_v5, 0.0 }
 0x1df   : > { %v742_v8 = vmax.f32 %v720_v7, 0.0 }
 0x1e1   : > { %1360 = vmatprep.mubr.msk.f32.mxu0 %vm309_vm0, %v742_v8 }
 0x1e2   : > { %1361 = vmatmul.mubr.msk.f32.gmra.mrb[22].mxu0 %vm309_vm0, %v743_v9 }
 0x299   : > { %v1341_v11 = vpop.f32.mrb[8].mxu0 }
 0x29a   : > { %v875_v12 = vadd.f32 %v1341_v11, %v1658_v10  ;;  %v869_v13 = vpop.f32.mrb[9].mxu0 }
 0x29b   : > { %v870_v14 = vadd.f32 %v1658_v10, %v869_v13 }
 0x29c   : > { %v1178_v15 = vmul.f32 -1.442695, %v875_v12 }
 0x29d   : > { %v1177_v16 = vmul.f32 -1.442695, %v870_v14  ;;  %v1344_v17 = vpop.f32.mrb[10].mxu0 }
 0x29e   : > { %1407 = vpow2.f32 %v1178_v15  ;;  %v885_v18 = vadd.f32 %v1344_v17, %v1658_v10  ;;  %v879_v19 = vpop.f32.mrb[11].mxu0 }
 0x29f   : > { %1409 = vpow2.f32 %v1177_v16  ;;  %v880_v20 = vadd.f32 %v1658_v10, %v879_v19 }
 0x2a0   : > { %v1180_v21 = vmul.f32 -1.442695, %v885_v18 }
 0x2a1   : > { %v1179_v22 = vmul.f32 -1.442695, %v880_v20  ;;  %v1347_v23 = vpop.f32.mrb[12].mxu0 }
 0x2a2   : > { %1411 = vpow2.f32 %v1180_v21  ;;  %v895_v24 = vadd.f32 %v1347_v23, %v1658_v10  ;;  %v889_v25 = vpop.f32.mrb[13].mxu0 }
 0x2a3   : > { %1413 = vpow2.f32 %v1179_v22  ;;  %v890_v26 = vadd.f32 %v1658_v10, %v889_v25 }
 0x2a4   : > { %v1182_v27 = vmul.f32 -1.442695, %v895_v24 }
 0x2a5   : > { %v1181_v28 = vmul.f32 -1.442695, %v890_v26  ;;  %v1350_v29 = vpop.f32.mrb[14].mxu0 }
 0x2a6   : > { %1415 = vpow2.f32 %v1182_v27  ;;  %v905_v30 = vadd.f32 %v1350_v29, %v1658_v10  ;;  %v899_v31 = vpop.f32.mrb[15].mxu0 }
 0x2a7   : > { %1417 = vpow2.f32 %v1181_v28  ;;  %v900_v32 = vadd.f32 %v1658_v10, %v899_v31 }
 0x2a8   : > { %v1408_v33 = vpop.eup %1407  ;;  %v1184_v34 = vmul.f32 -1.442695, %v905_v30 }
 0x2a9   : > { %v1410_v35 = vpop.eup %1409  ;;  %v997_v36 = vadd.f32 1.0, %v1408_v33  ;;  %v1183_v37 = vmul.f32 -1.442695, %v900_v32  ;;  %v1353_v38 = vpop.f32.mrb[16].mxu0 }
 0x2aa   : > { %v996_v39 = vadd.f32 1.0, %v1410_v35  ;;  %1419 = vpow2.f32 %v1184_v34  ;;  %v915_v40 = vadd.f32 %v1353_v38, %v1658_v10  ;;  %v909_v41 = vpop.f32.mrb[17].mxu0 }
 0x2ab   : > { %1421 = vrcp.f32 %v997_v36  ;;  %v910_v42 = vadd.f32 %v1658_v10, %v909_v41 }
 0x2ac   : > { %v1412_v43 = vpop.eup %1411  ;;  %1423 = vrcp.f32 %v996_v39  ;;  %v1186_v44 = vmul.f32 -1.442695, %v915_v40 }
 0x2ad   : > { %v1414_v45 = vpop.eup %1413  ;;  %v999_v46 = vadd.f32 1.0, %v1412_v43  ;;  %1425 = vpow2.f32 %v1183_v37  ;;  %v1185_v47 = vmul.f32 -1.442695, %v910_v42  ;;  %v1356_v48 = vpop.f32.mrb[18].mxu0 }
 0x2ae   : > { %v998_v49 = vadd.f32 1.0, %v1414_v45  ;;  %1427 = vpow2.f32 %v1186_v44  ;;  %v925_v50 = vadd.f32 %v1356_v48, %v1658_v10  ;;  %v919_v51 = vpop.f32.mrb[19].mxu0 }
 0x2af   : > { %1429 = vrcp.f32 %v999_v46  ;;  %v920_v52 = vadd.f32 %v1658_v10, %v919_v51 }
 0x2b0   : > { %v1416_v53 = vpop.eup %1415  ;;  %1431 = vrcp.f32 %v998_v49  ;;  %v1188_v54 = vmul.f32 -1.442695, %v925_v50 }
 0x2b1   : > { %v1418_v55 = vpop.eup %1417  ;;  %v1001_v56 = vadd.f32 1.0, %v1416_v53  ;;  %1433 = vpow2.f32 %v1185_v47  ;;  %v1187_v57 = vmul.f32 -1.442695, %v920_v52  ;;  %v1359_v58 = vpop.f32.mrb[20].mxu0 }
 0x2b2   : > { %v1000_v59 = vadd.f32 1.0, %v1418_v55  ;;  %1435 = vpow2.f32 %v1188_v54  ;;  %v935_v60 = vadd.f32 %v1359_v58, %v1658_v10  ;;  %v929_v61 = vpop.f32.mrb[21].mxu0 }
 0x2b3   : > { %1437 = vrcp.f32 %v1001_v56  ;;  %v930_v62 = vadd.f32 %v1658_v10, %v929_v61 }
 0x2b4   : > { %v1420_v63 = vpop.eup %1419  ;;  %1439 = vrcp.f32 %v1000_v59  ;;  %v1190_v0 = vmul.f32 -1.442695, %v935_v60 }
 0x2b5   : > { %v1422_v1 = vpop.eup %1421  ;;  %v1003_v2 = vadd.f32 1.0, %v1420_v63  ;;  %1441 = vpow2.f32 %v1187_v57  ;;  %v1189_v3 = vmul.f32 -1.442695, %v930_v62  ;;  %v1362_v4 = vpop.f32.mrb[22].mxu0 }
 0x2b6   : > { %v1424_v5 = vpop.eup %1423  ;;  %1046 = vst.msk [vmem:[%s1678_s29 + $0x8] sm:$0xff] %vm1044_vm2, %v1422_v1  ;;  %1443 = vpow2.f32 %v1190_v0  ;;  %v945_v6 = vadd.f32 %v1362_v4, %v1658_v10  ;;  %v939_v7 = vpop.f32.mrb[23].mxu0 }
 0x2b7   : > { %v1426_v8 = vpop.eup %1425  ;;  %1045 = vst.msk [vmem:[%s1678_s29] sm:$0xff] %vm1044_vm2, %v1424_v5  ;;  %1445 = vrcp.f32 %v1003_v2  ;;  %v940_v9 = vadd.f32 %v1658_v10, %v939_v7 }
 0x2b8   : > { %v1428_v11 = vpop.eup %1427  ;;  %v1002_v12 = vadd.f32 1.0, %v1426_v8  ;;  %1447 = vpow2.f32 %v1189_v3  ;;  %v1192_v13 = vmul.f32 -1.442695, %v945_v6 }
 0x2b9   : > { %v1430_v14 = vpop.eup %1429  ;;  %v1005_v15 = vadd.f32 1.0, %v1428_v11  ;;  %v1191_v16 = vmul.f32 -1.442695, %v940_v9 }
 0x2ba   : > { %v1432_v17 = vpop.eup %1431  ;;  %1048 = vst.msk [vmem:[%s1678_s29 + $0x18] sm:$0xff] %vm1044_vm2, %v1430_v14  ;;  %1449 = vrcp.f32 %v1002_v12 }
 0x2bb   : > { %v1434_v18 = vpop.eup %1433  ;;  %1047 = vst.msk [vmem:[%s1678_s29 + $0x10] sm:$0xff] %vm1044_vm2, %v1432_v17  ;;  %1451 = vrcp.f32 %v1005_v15 }
 0x2bc   : > { %v1436_v19 = vpop.eup %1435  ;;  %v1004_v20 = vadd.f32 1.0, %v1434_v18  ;;  %1453 = vpow2.f32 %v1192_v13 }
 0x2bd   : > { %v1438_v10 = vpop.eup %1437  ;;  %v1007_v21 = vadd.f32 1.0, %v1436_v19  ;;  %1455 = vpow2.f32 %v1191_v16 }
 0x2be   : > { %v1440_v22 = vpop.eup %1439  ;;  %1050 = vst.msk [vmem:[%s1678_s29 + $0x28] sm:$0xff] %vm1044_vm2, %v1438_v10  ;;  %1457 = vrcp.f32 %v1004_v20 }
 0x2bf   : > { %v1442_v23 = vpop.eup %1441  ;;  %1049 = vst.msk [vmem:[%s1678_s29 + $0x20] sm:$0xff] %vm1044_vm2, %v1440_v22  ;;  %1459 = vrcp.f32 %v1007_v21 }
 0x2c0   : > { %v1444_v24 = vpop.eup %1443  ;;  %v1006_v25 = vadd.f32 1.0, %v1442_v23 }
 0x2c1   : > { %v1446_v26 = vpop.eup %1445  ;;  %v1009_v27 = vadd.f32 1.0, %v1444_v24 }
 0x2c2   : > { %v1448_v28 = vpop.eup %1447  ;;  %1052 = vst.msk [vmem:[%s1678_s29 + $0x38] sm:$0xff] %vm1044_vm2, %v1446_v26  ;;  %1461 = vrcp.f32 %v1006_v25 }
 0x2c3   : > { %1463 = vrcp.f32 %v1009_v27  ;;  %v1008_v29 = vadd.f32 1.0, %v1448_v28 }
 0x2c4   : > { %v1450_v30 = vpop.eup %1449 }
 0x2c5   : > { %v1452_v31 = vpop.eup %1451  ;;  %1051 = vst.msk [vmem:[%s1678_s29 + $0x30] sm:$0xff] %vm1044_vm2, %v1450_v30  ;;  %1465 = vrcp.f32 %v1008_v29 }
 0x2c6   : > { %v1454_v32 = vpop.eup %1453  ;;  %1054 = vst.msk [vmem:[%s1678_s29 + $0x48] sm:$0xff] %vm1044_vm2, %v1452_v31 }
 0x2c7   : > { %v1456_v33 = vpop.eup %1455  ;;  %v1011_v34 = vadd.f32 1.0, %v1454_v32 }
 0x2c8   : > { %v1458_v35 = vpop.eup %1457  ;;  %v1010_v36 = vadd.f32 1.0, %v1456_v33 }
 0x2c9   : > { %v1460_v37 = vpop.eup %1459  ;;  %1053 = vst.msk [vmem:[%s1678_s29 + $0x40] sm:$0xff] %vm1044_vm2, %v1458_v35  ;;  %1467 = vrcp.f32 %v1011_v34 }
 0x2ca   : > { %1056 = vst.msk [vmem:[%s1678_s29 + $0x58] sm:$0xff] %vm1044_vm2, %v1460_v37  ;;  %1469 = vrcp.f32 %v1010_v36 }
 0x2cc   : > { %v1462_v38 = vpop.eup %1461 }
 0x2cd   : > { %v1464_v39 = vpop.eup %1463  ;;  %1055 = vst.msk [vmem:[%s1678_s29 + $0x50] sm:$0xff] %vm1044_vm2, %v1462_v38 }
 0x2ce   : > { %1058 = vst.msk [vmem:[%s1678_s29 + $0x68] sm:$0xff] %vm1044_vm2, %v1464_v39 }
 0x2cf   : > { %v1466_v40 = vpop.eup %1465 }
 0x2d0   : > { %1057 = vst.msk [vmem:[%s1678_s29 + $0x60] sm:$0xff] %vm1044_vm2, %v1466_v40 }
 0x2d3   : > { %v1468_v41 = vpop.eup %1467 }
 0x2d4   : > { %v1470_v42 = vpop.eup %1469  ;;  %1060 = vst.msk [vmem:[%s1678_s29 + $0x78] sm:$0xff] %vm1044_vm2, %v1468_v41 }
 0x2d5   : > { %1059 = vst.msk [vmem:[%s1678_s29 + $0x70] sm:$0xff] %vm1044_vm2, %v1470_v42 }
 0x2d6 PF: > { %s17_s24 = sadd.s32 1, %s1477_s24  }
 0x2d7   : > { %p14_p4 = scmp.ge.s32.totalorder %s17_s24, 4  }
 0x2d9   :  { %16 = sbr.rel (!%p14_p4) target bundleno = 1 (0x1), region = 78 }

</bundles_post_ra>
